<compile_context>
chip_gen: v5e
topology: v5e:2x2
jax: 0.10.0
libtpu: 0.0.40
codegen_flags: <defaults>
</compile_context>

<pallas_src>
import math

import jax
import jax.numpy as jnp
from jax.experimental import pallas as pl
from jax.experimental.pallas import tpu as pltpu


def build_positional_encoding(model_dim: int, max_len: int = 5000,
                              dtype=jnp.float32) -> jnp.ndarray:
    """Deterministic sinusoidal table, identical to the PyTorch __init__.

    Store/cache this in the model dtype so the forward-pass cast is a no-op.
    """
    positions = jnp.arange(0, max_len, dtype=jnp.float32)[:, None]          # [max_len, 1]
    div_term = jnp.exp(
        jnp.arange(0, model_dim, 2, dtype=jnp.float32)
        * -(math.log(10000.0) / model_dim)
    )                                                                        # [ceil(D/2)]
    enc = jnp.zeros((max_len, model_dim), dtype=jnp.float32)
    enc = enc.at[:, 0::2].set(jnp.sin(positions * div_term))
    # slice div_term so odd model_dim does not shape-error (cos has floor(D/2) cols)
    enc = enc.at[:, 1::2].set(jnp.cos(positions * div_term[: model_dim // 2]))
    return enc.astype(dtype)                                                 # [max_len, D]


def _pe_add_kernel(x_ref, enc_ref, o_ref):
    # Path A: x/o (tile_b, S, D), enc (1, S, D)  -> broadcast over the leading
    #         non-layout dim (pure vreg replication, no XLU).
    # Path B: x/o/enc all (1, tile_s, D)         -> flat vreg add.
    o_ref[...] = x_ref[...] + enc_ref[...]


def _per_buffer_budget_bytes() -> int:
    """Per-buffer tile budget sized for the default scoped VMEM limit.

    6 live buffers (x, enc, out x double-buffer):
      * 2 MiB/buffer -> 12 MiB total: fits the 16 MiB default on v5e (and any
        unknown generation) with headroom.
      * 4 MiB/buffer -> 24 MiB total: fits the 32 MiB default on v6e / v7x
        (and stays far below v7x's 64 MiB physical VMEM per TensorCore).
    """
    budget = 2 * 1024 * 1024
    try:
        kind = jax.devices()[0].device_kind.lower()
        if "v6" in kind or "v7" in kind:
            budget = 4 * 1024 * 1024
    except Exception:  # pragma: no cover - keep the conservative default
        pass
    return budget


def _round_down(v: int, mult: int) -> int:
    return max(mult, (v // mult) * mult)


def positional_encoding_forward(x: jnp.ndarray, encoding: jnp.ndarray, *,
                                tile_budget_bytes: int | None = None) -> jnp.ndarray:
    """x: [B, S, D].  encoding: [max_len, D].  Returns x + encoding[:S]."""
    B, S, D = x.shape
    enc = encoding[:S, :]
    if enc.dtype != x.dtype:
        # No-op when the table is cached in the model dtype (recommended).
        enc = enc.astype(x.dtype)

    itemsize = jnp.dtype(x.dtype).itemsize
    budget = tile_budget_bytes if tile_budget_bytes is not None else _per_buffer_budget_bytes()
    enc_bytes = S * D * itemsize

    cost = pl.CostEstimate(
        flops=B * S * D,
        transcendentals=0,
        bytes_accessed=2 * B * S * D * itemsize + enc_bytes,
    )
    enc3 = enc[None, :, :]  # (1, S, D): keeps the kernel add broadcast-only

    if enc_bytes <= budget:
        # --- Path A: enc resident, tile over the batch dim -------------------
        tile_b = max(1, min(B, budget // enc_bytes))
        grid = (pl.cdiv(B, tile_b),)
        out = pl.pallas_call(
            _pe_add_kernel,
            out_shape=jax.ShapeDtypeStruct((B, S, D), x.dtype),
            grid=grid,
            in_specs=[
                pl.BlockSpec((tile_b, S, D), lambda i: (i, 0, 0)),
                # constant block index -> fetched once, DMA skipped afterwards
                pl.BlockSpec((1, S, D), lambda i: (0, 0, 0)),
            ],
            out_specs=pl.BlockSpec((tile_b, S, D), lambda i: (i, 0, 0)),
            compiler_params=pltpu.CompilerParams(
                dimension_semantics=("parallel",),
            ),
            cost_estimate=cost,
        )(x, enc3)
        return out

    # --- Path B: seq-tiled (long sequences) ----------------------------------
    # Sublane packing per dtype width; partial trailing blocks are masked by
    # Pallas, so S needs no divisibility and there is no slow fallback path.
    sublane = {4: 8, 2: 16, 1: 32}.get(itemsize, 8)
    tile_s = min(S, _round_down(budget // (D * itemsize), sublane))
    s_tiles = pl.cdiv(S, tile_s)
    out = pl.pallas_call(
        _pe_add_kernel,
        out_shape=jax.ShapeDtypeStruct((B, S, D), x.dtype),
        # B innermost: enc block index depends only on the outer s axis, so the
        # enc DMA is skipped for B-1 of every B grid steps.
        grid=(s_tiles, B),
        in_specs=[
            pl.BlockSpec((1, tile_s, D), lambda s, b: (b, s, 0)),
            pl.BlockSpec((1, tile_s, D), lambda s, b: (0, s, 0)),
        ],
        out_specs=pl.BlockSpec((1, tile_s, D), lambda s, b: (b, s, 0)),
        compiler_params=pltpu.CompilerParams(
            dimension_semantics=("parallel", "parallel"),
        ),
        cost_estimate=cost,
    )(x, enc3)
    return out


if __name__ == "__main__":
    # Small shapes consistent with forward: [batch_size, seq_len, model_dim].
    # model_dim is a multiple of 128 so output stores are lane-dense.
    B, S, D = 2, 8, 128
    MAX_LEN = 64  # small max_len for the synthetic test (module default 5000)

    key = jax.random.PRNGKey(0)
    x = jax.random.normal(key, (B, S, D), dtype=jnp.float32)
    encoding = build_positional_encoding(D, MAX_LEN)

    out = jax.block_until_ready(positional_encoding_forward(x, encoding))
    ref = x + encoding[None, :S, :]
    assert out.shape == (B, S, D)
    assert jnp.allclose(out, ref, atol=1e-6), "mismatch vs reference (enc-resident path)"

    # Exercise the batch-tiled grid with a partial trailing batch block
    # (tile_b=2 over B=3 -> masked last block).
    B1 = 3
    x1 = jax.random.normal(jax.random.PRNGKey(1), (B1, S, D), dtype=jnp.float32)
    out1 = jax.block_until_ready(
        positional_encoding_forward(x1, encoding, tile_budget_bytes=8 * 1024))
    ref1 = x1 + encoding[None, :S, :]
    assert jnp.allclose(out1, ref1, atol=1e-6), "mismatch vs reference (batch-tiled path)"

    # Exercise the seq-tiled grid (forced via a tiny budget) with a sequence
    # length that is NOT a multiple of the tile -> masked partial last block.
    B2, S2, D2 = 2, 200, 128
    x2 = jax.random.normal(jax.random.PRNGKey(2), (B2, S2, D2), dtype=jnp.float32)
    enc2 = build_positional_encoding(D2, 256)
    out2 = jax.block_until_ready(
        positional_encoding_forward(x2, enc2, tile_budget_bytes=32 * 1024))
    ref2 = x2 + enc2[None, :S2, :]
    assert jnp.allclose(out2, ref2, atol=1e-6), "mismatch vs reference (seq-tiled path)"

    print("KERNEL_OK")
</pallas_src>

<mosaic_0001>
module attributes {stable_mosaic.version = 11 : i64} {
  func.func @_pe_add_kernel(%arg0: i32, %arg1: memref<2x8x128xf32, #tpu.memory_space<vmem>>, %arg2: memref<1x8x128xf32, #tpu.memory_space<vmem>>, %arg3: memref<2x8x128xf32, #tpu.memory_space<vmem>>) attributes {dimension_semantics = [#tpu.dimension_semantics<parallel>], iteration_bounds = array<i64: 1>, scalar_prefetch = 0 : i64, scratch_operands = 0 : i64, tpu.core_type = #tpu.core_type<tc>, window_params = [{transform_indices = @transform_0, window_bounds = array<i64: 2, 8, 128>}, {pipeline_mode = #tpu.pipeline_mode<synchronous>, transform_indices = @transform_1, window_bounds = array<i64: 1, 8, 128>}, {transform_indices = @transform_2, window_bounds = array<i64: 2, 8, 128>}]} {
    %c0 = arith.constant 0 : index
    %c0_0 = arith.constant 0 : index
    %c0_1 = arith.constant 0 : index
    %0 = vector.load %arg1[%c0, %c0_0, %c0_1] : memref<2x8x128xf32, #tpu.memory_space<vmem>>, vector<2x8x128xf32>
    %c0_2 = arith.constant 0 : index
    %c0_3 = arith.constant 0 : index
    %c0_4 = arith.constant 0 : index
    %1 = vector.load %arg2[%c0_2, %c0_3, %c0_4] : memref<1x8x128xf32, #tpu.memory_space<vmem>>, vector<1x8x128xf32>
    %2 = vector.broadcast %1 : vector<1x8x128xf32> to vector<2x8x128xf32>
    %3 = arith.addf %0, %2 : vector<2x8x128xf32>
    %c0_5 = arith.constant 0 : index
    %c0_6 = arith.constant 0 : index
    %c0_7 = arith.constant 0 : index
    %4 = vector.load %arg3[%c0_5, %c0_6, %c0_7] : memref<2x8x128xf32, #tpu.memory_space<vmem>>, vector<2x8x128xf32>
    tpu.vector_store %arg3[%c0_5, %c0_6, %c0_7], %3 {strides = array<i32>} : memref<2x8x128xf32, #tpu.memory_space<vmem>>, vector<2x8x128xf32>,
    return
  }
  func.func @transform_0(%arg0: i32) -> (i32, i32, i32) {
    %c0_i32 = arith.constant 0 : i32
    %c0_i32_0 = arith.constant 0 : i32
    %c0_i32_1 = arith.constant 0 : i32
    return %arg0, %c0_i32, %c0_i32_0 : i32, i32, i32
  }
  func.func @transform_1(%arg0: i32) -> (i32, i32, i32) {
    %c0_i32 = arith.constant 0 : i32
    %c0_i32_0 = arith.constant 0 : i32
    %c0_i32_1 = arith.constant 0 : i32
    %c0_i32_2 = arith.constant 0 : i32
    return %c0_i32, %c0_i32_0, %c0_i32_1 : i32, i32, i32
  }
  func.func @transform_2(%arg0: i32) -> (i32, i32, i32) {
    %c0_i32 = arith.constant 0 : i32
    %c0_i32_0 = arith.constant 0 : i32
    %c0_i32_1 = arith.constant 0 : i32
    return %arg0, %c0_i32, %c0_i32_0 : i32, i32, i32
  }
}

</mosaic_0001>

<bundles_post_ra>
// kernel: tpu_custom_call.1
= control target key start
LH: loop header
LB: loop body
LE: loop exit
PB: predicated region body
PF: predicated region fallthrough
CT: control target
= control target key end

     0   :  { %7 = vsyncpa [#allocation3], 0  ;;  %s181_s0 = inlined_call_operand.hbm [shape: f32[2,8,128], index: 0, kind: input, shape index: {}]   ;;  %s182_s1 = inlined_call_operand.hbm [shape: f32[1,8,128], index: 1, kind: input, shape index: {}]   ;;  %s183_s2 = inlined_call_operand.hbm [shape: f32[2,8,128], index: 2, kind: output, shape index: {}]  }
   0x1   :  { %8 = vsyncpa [#allocation6], 0 }
   0x2   :  { %9 = vsyncpa [#allocation4], 0  ;;  %s14_s11 = sshll.u32 %s181_s0, 4  ;;  %s152_s12 = smov [#allocation2]   ;;  %s15_s11 = int_to_ptr.hbm [resolvable:$true] %s14_s11 }
   0x3   :  { %s16_s13 = sshll.u32 %s152_s12, 4  ;;  %s28_s16 = sshll.u32 %s182_s1, 4  ;;  %s17_s13 = int_to_ptr.vmem [resolvable:$true] %s16_s13  ;;  %s29_s16 = int_to_ptr.hbm [resolvable:$true] %s28_s16 }
   0x4   :  { %s153_s17 = smov 128   ;;  %s154_s18 = smov 8  }
   0x5   :  { %22 = dma.hbm_to_vmem [thread:$0]  %s15_s11, 256, %s17_s13, [#allocation3], %s153_s17, %s153_s17, %s154_s18  }
   0x6   :  { %s155_s19 = smov [#allocation5]  }
   0x7   :  { %s30_s20 = sshll.u32 %s155_s19, 4  ;;  %s31_s20 = int_to_ptr.vmem [resolvable:$true] %s30_s20 }
   0x8   :  { %33 = dma.hbm_to_vmem [thread:$0]  %s29_s16, 128, %s31_s20, [#allocation6]  }
   0x9   :  { %146 = dma.done.wait [#allocation3], 256  }
   0xa   :  { %147 = vsyncadd [#allocation3], 4294967040 }
   0xb   :  { %148 = dma.done.wait [#allocation6], 128  }
   0xc   :  { %149 = vsyncadd [#allocation6], 4294967168  ;;  %s156_s0 = smov [#allocation7]   ;;  %s55_s24 = sshll.u32 %s183_s2, 4  ;;  %v42_v0 = vld [vmem:[#allocation2] sm:$0xff]  ;;  %v44_v1 = vld [vmem:[#allocation5] sm:$0xff]  ;;  %s56_s24 = int_to_ptr.hbm [resolvable:$true] %s55_s24 }
   0xd   :  { %s53_s21 = sshll.u32 %s156_s0, 4  ;;  %v43_v2 = vld [vmem:[#allocation2 + $0x8] sm:$0xff]  ;;  %v45_v3 = vadd.f32 %v44_v1, %v42_v0  ;;  %s54_s21 = int_to_ptr.vmem [resolvable:$true] %s53_s21 }
   0xe   :  { %v46_v4 = vadd.f32 %v44_v1, %v43_v2 }
   0xf   :  { %47 = vst [vmem:[#allocation7] sm:$0xff] %v45_v3 }
  0x10   :  { %48 = vst [vmem:[#allocation7 + $0x8] sm:$0xff] %v46_v4 }
  0x11   :  { %61 = dma.vmem_to_hbm [thread:$0]  %s54_s21, 256, %s56_s24, [#allocation4], %s153_s17, %s153_s17, %s154_s18  }
  0x12   :  { %150 = dma.done.wait [#allocation4], 256  }
  0x13   :  { %151 = vsyncadd [#allocation4], 4294967040 }
  0x14   :  { %66 = vsyncpa [#allocation3], 1 }
  0x15   :  { %67 = vsyncpa [#allocation6], 1 }
  0x16   :  { %68 = vsyncpa [#allocation4], 1 }

</bundles_post_ra>
